<compile_context>
chip_gen: v7x
topology: tpu7x:2x2x1
jax: 0.10.0
libtpu: 0.0.40
codegen_flags: <defaults>
</compile_context>

<pallas_src>
import functools
import math

import jax
import jax.numpy as jnp
from jax.experimental import pallas as pl
from jax.experimental.pallas import tpu as pltpu


def _ceil_to(x, m):
    return ((x + m - 1) // m) * m


def _nbytes(*arrays):
    return int(sum(a.size * a.dtype.itemsize for a in arrays))


_VMEM = pl.BlockSpec(memory_space=pltpu.MemorySpace.VMEM)
_SMEM = pl.BlockSpec(memory_space=pltpu.MemorySpace.SMEM)


# ----------------------------------------------------------------------------
# Kernel bodies
# ----------------------------------------------------------------------------

def _gru_blend(gates, h, hp):
    """PyTorch GRU gate math on the 4-block gate slab [r | z | n_x | n_h]."""
    r = jax.nn.sigmoid(gates[:, 0 * hp:1 * hp])
    z = jax.nn.sigmoid(gates[:, 1 * hp:2 * hp])
    n = jnp.tanh(gates[:, 2 * hp:3 * hp] + r * gates[:, 3 * hp:4 * hp])
    return (1.0 - z) * n + z * h


def _embed_kernel(ids_ref, table_ref, xt_ref, *, v1):
    """mode='embedding': per-row gather + ReLU (Dropout == identity)."""
    for b in range(xt_ref.shape[0]):                    # B is small & static
        idx = jnp.clip(ids_ref[b], 0, v1 - 1)           # bounds-safe gather
        row = table_ref[pl.ds(idx, 1), :]               # (1, E_pad)
        xt_ref[pl.ds(b, 1), :] = jnp.maximum(row, 0.0)


def _gru_kernel(x_ref, h_ref, wx_ref, wh_ref, b_ref, hnew_ref, *, hp):
    """mode='bot_rnn'/'top_rnn': one GRU step, lane-dense (B, 128) state."""
    h = h_ref[...]
    wdt = wx_ref.dtype
    gates = (jnp.dot(x_ref[...].astype(wdt), wx_ref[...],
                     preferred_element_type=jnp.float32)
             + jnp.dot(h.astype(wdt), wh_ref[...],
                       preferred_element_type=jnp.float32)
             + b_ref[...])
    hnew_ref[...] = _gru_blend(gates, h, hp)


def _gru_output_kernel(x_ref, h_ref, wx_ref, wh_ref, b_ref, ow_ref, ob_ref,
                       hnew_ref, logits_ref, *, hp):
    """Fused top-GRU step + output Linear (logits from hnew in-register)."""
    h = h_ref[...]
    wdt = wx_ref.dtype
    gates = (jnp.dot(x_ref[...].astype(wdt), wx_ref[...],
                     preferred_element_type=jnp.float32)
             + jnp.dot(h.astype(wdt), wh_ref[...],
                       preferred_element_type=jnp.float32)
             + b_ref[...])
    hnew = _gru_blend(gates, h, hp)
    hnew_ref[...] = hnew
    logits_ref[...] = (jnp.dot(hnew.astype(ow_ref.dtype), ow_ref[...],
                               preferred_element_type=jnp.float32)
                       + ob_ref[...])


def _embed_gru_kernel(ids_ref, table_ref, xloc_ref, h2t_ref, h_ref,
                      wxe_ref, wxl_ref, wxt_ref, wh_ref, b_ref,
                      xt_ref, hnew_ref, *, hp, v1):
    """Fused embedding gather + ReLU + bot-GRU step (split-K input dots)."""
    for b in range(xt_ref.shape[0]):
        idx = jnp.clip(ids_ref[b], 0, v1 - 1)
        row = table_ref[pl.ds(idx, 1), :]
        xt_ref[pl.ds(b, 1), :] = jnp.maximum(row, 0.0)
    emb = xt_ref[...]                                   # (B, E_pad) f32
    h = h_ref[...]
    wdt = wxe_ref.dtype
    gates = (jnp.dot(emb.astype(wdt), wxe_ref[...],
                     preferred_element_type=jnp.float32)
             + jnp.dot(xloc_ref[...].astype(wdt), wxl_ref[...],
                       preferred_element_type=jnp.float32)
             + jnp.dot(h2t_ref[...].astype(wdt), wxt_ref[...],
                       preferred_element_type=jnp.float32)
             + jnp.dot(h.astype(wdt), wh_ref[...],
                       preferred_element_type=jnp.float32)
             + b_ref[...])
    hnew_ref[...] = _gru_blend(gates, h, hp)


def _output_kernel(x_ref, ow_ref, ob_ref, logits_ref, *, h):
    """mode='output': logits = vec @ W + b (Dropout == identity)."""
    w = ow_ref[0:h, :]
    logits_ref[...] = (jnp.dot(x_ref[...].astype(w.dtype), w,
                               preferred_element_type=jnp.float32)
                       + ob_ref[...])


# ----------------------------------------------------------------------------
# Module wrapper (parameters created deterministically in-script)
# ----------------------------------------------------------------------------

class TaskModuleCapPallas:
    def __init__(self, K, cap_hidden_dim, cap_emb_dim, vocab_size, cap_att_dim,
                 X_loc_dim, key, weight_dtype=jnp.bfloat16):
        self.name = 'TaskModuleCap'
        self.num_glimpse = 1
        self.K = K
        self.cap_hidden_dim = cap_hidden_dim
        self.cap_emb_dim = cap_emb_dim
        self.vocab_size = vocab_size
        self.cap_att_dim = cap_att_dim
        self.X_loc_dim = X_loc_dim
        self.seq_length = 16
        self.task_v_size = 512
        self.first_layer_input_dim = cap_emb_dim + X_loc_dim + cap_hidden_dim
        self.second_layer_input_dim = cap_hidden_dim + 1000
        self.weight_dtype = weight_dtype

        H, E = cap_hidden_dim, cap_emb_dim
        assert H <= 128, "gate-per-vreg layout assumes cap_hidden_dim <= 128"
        self.H, self.E = H, E
        self.V1 = vocab_size + 1
        self.Hp = _ceil_to(H, 128)          # lane-dense hidden width
        self.G = 4 * self.Hp                # gate slab: [r | z | n_x | n_h]
        self.E_pad = _ceil_to(E, 128)
        self.V1_pad = _ceil_to(self.V1, 128)
        self.V1_8 = _ceil_to(self.V1, 8)
        self.din1 = self.first_layer_input_dim
        self.din2 = self.second_layer_input_dim

        ks = jax.random.split(key, 6)

        # Embedding table: dense 2-D (ceil8(V+1), E_pad), f32 (gathered exactly).
        tbl = jax.random.normal(ks[0], (self.V1, E), jnp.float32)
        self.embed_table = (jnp.zeros((self.V1_8, self.E_pad), jnp.float32)
                            .at[:self.V1, :E].set(tbl))

        # GRUs (PyTorch gate order r, z, n; weights stored transposed).
        self.bot_params, self._raw_bot, bot_wx_f32 = self._pack_gru(ks[1], self.din1)
        self.top_params, self._raw_top, _ = self._pack_gru(ks[2], self.din2)

        # Row-split copies of the bot input slab for the fused embed+bot path:
        # rows [0:E) act on the lane-padded embedding, [E:E+X_loc) on X_loc,
        # [E+X_loc:din1) on h_2_t.
        wxe = (jnp.zeros((self.E_pad, self.G), jnp.float32)
               .at[:E].set(bot_wx_f32[:E]))
        wxl = bot_wx_f32[E:E + X_loc_dim]
        wxt = bot_wx_f32[E + X_loc_dim:self.din1]
        self.bot_fused_wx = (wxe.astype(weight_dtype), wxl.astype(weight_dtype),
                             wxt.astype(weight_dtype))

        # Output head Linear(H, V+1), transposed + padded to (Hp, V1_pad).
        bound = 1.0 / math.sqrt(H)
        ow = jax.random.uniform(ks[3], (H, self.V1), jnp.float32, -bound, bound)
        ob = jax.random.uniform(ks[4], (self.V1,), jnp.float32, -bound, bound)
        self._raw_out = (ow, ob)
        self.out_w = (jnp.zeros((self.Hp, self.V1_pad), jnp.float32)
                      .at[:H, :self.V1].set(ow)).astype(weight_dtype)
        self.out_b = (jnp.zeros((1, self.V1_pad), jnp.float32)
                      .at[0, :self.V1].set(ob))

    def _pack_gru(self, key, din):
        H, Hp, G = self.H, self.Hp, self.G
        bound = 1.0 / math.sqrt(H)
        kk = jax.random.split(key, 12)
        u = lambda k, s: jax.random.uniform(k, s, jnp.float32, -bound, bound)
        w_ih = [u(kk[g], (din, H)) for g in range(3)]        # r, z, n
        w_hh = [u(kk[3 + g], (H, H)) for g in range(3)]
        b_ih = [u(kk[6 + g], (H,)) for g in range(3)]
        b_hh = [u(kk[9 + g], (H,)) for g in range(3)]
        wx = jnp.zeros((din, G), jnp.float32)
        wh = jnp.zeros((Hp, G), jnp.float32)
        b = jnp.zeros((1, G), jnp.float32)
        for g in range(3):                                   # x part of r, z, n
            wx = wx.at[:, g * Hp:g * Hp + H].set(w_ih[g])
        for g in range(2):                                   # h part of r, z
            wh = wh.at[:H, g * Hp:g * Hp + H].set(w_hh[g])
            b = b.at[0, g * Hp:g * Hp + H].set(b_ih[g] + b_hh[g])  # folded bias
        wh = wh.at[:H, 3 * Hp:3 * Hp + H].set(w_hh[2])       # n-gate h part
        b = b.at[0, 2 * Hp:2 * Hp + H].set(b_ih[2])          # b_in
        b = b.at[0, 3 * Hp:3 * Hp + H].set(b_hh[2])          # b_hn (for r* term)
        raw = dict(w_ih=w_ih, w_hh=w_hh, b_ih=b_ih, b_hh=b_hh)
        params = (wx.astype(self.weight_dtype), wh.astype(self.weight_dtype), b)
        return params, raw, wx

    # ---- helpers ------------------------------------------------------------

    def _prep_hidden(self, hidden, batch):
        if hidden is None:
            return jnp.zeros((batch, self.Hp), jnp.float32)
        h = jnp.asarray(hidden, jnp.float32)
        if h.ndim == 3:                       # (1, B, H) as returned by the modes
            h = h.reshape(-1, h.shape[-1])
        if h.shape[-1] != self.Hp:
            h = jnp.pad(h, ((0, 0), (0, self.Hp - h.shape[-1])))
        return h

    # ---- mode='embedding' ---------------------------------------------------

    def _embedding(self, ind):
        ids = jnp.asarray(ind, jnp.int32).reshape(-1)
        B = ids.shape[0]
        cost = pl.CostEstimate(flops=B * self.E_pad, transcendentals=0,
                               bytes_accessed=_nbytes(ids, self.embed_table)
                               + B * self.E_pad * 4)
        xt = pl.pallas_call(
            functools.partial(_embed_kernel, v1=self.V1),
            out_shape=jax.ShapeDtypeStruct((B, self.E_pad), jnp.float32),
            in_specs=[_SMEM, _VMEM],
            out_specs=_VMEM,
            cost_estimate=cost,
        )(ids, self.embed_table)
        return xt[:, :self.E]

    # ---- mode='bot_rnn' / 'top_rnn' ----------------------------------------

    def _gru_call(self, x, h0, params):
        wx, wh, b = params
        B = x.shape[0]
        cost = pl.CostEstimate(
            flops=2 * B * (x.shape[1] + self.Hp) * self.G,
            transcendentals=3 * B * self.Hp,
            bytes_accessed=_nbytes(x, h0, wx, wh, b) + B * self.Hp * 4)
        return pl.pallas_call(
            functools.partial(_gru_kernel, hp=self.Hp),
            out_shape=jax.ShapeDtypeStruct((B, self.Hp), jnp.float32),
            in_specs=[_VMEM] * 5,
            out_specs=_VMEM,
            cost_estimate=cost,
        )(x, h0, wx, wh, b)

    def _gru_mode(self, cap_input, hidden, params, din):
        x = jnp.asarray(cap_input, jnp.float32).reshape(-1, din)   # .view(-1, d)
        B = x.shape[0]
        h0 = self._prep_hidden(hidden, B)
        hnew = self._gru_call(x, h0, params)
        return hnew[:, :self.H], hnew[None, :, :self.H]

    # ---- mode='output' ------------------------------------------------------

    def _output(self, vec):
        x = jnp.asarray(vec, jnp.float32).reshape(-1, self.H)
        B = x.shape[0]
        cost = pl.CostEstimate(
            flops=2 * B * self.H * self.V1_pad, transcendentals=0,
            bytes_accessed=_nbytes(x, self.out_w, self.out_b)
            + B * self.V1_pad * 4)
        logits = pl.pallas_call(
            functools.partial(_output_kernel, h=self.H),
            out_shape=jax.ShapeDtypeStruct((B, self.V1_pad), jnp.float32),
            in_specs=[_VMEM] * 3,
            out_specs=_VMEM,
            cost_estimate=cost,
        )(x, self.out_w, self.out_b)
        return logits[:, :self.V1]

    # ---- fused fast paths (compose the modes above in one pallas_call) ------

    def top_rnn_output(self, cap_input, hidden):
        """Fused mode='top_rnn' + mode='output'.

        Returns (logits (B,V+1), output (B,H), hidden_padded (B,128)); feed
        hidden_padded straight back to the next step to stay lane-dense.
        """
        x = jnp.asarray(cap_input, jnp.float32).reshape(-1, self.din2)
        B = x.shape[0]
        h0 = self._prep_hidden(hidden, B)
        wx, wh, b = self.top_params
        cost = pl.CostEstimate(
            flops=2 * B * ((self.din2 + self.Hp) * self.G
                           + self.Hp * self.V1_pad),
            transcendentals=3 * B * self.Hp,
            bytes_accessed=_nbytes(x, h0, wx, wh, b, self.out_w, self.out_b)
            + B * (self.Hp + self.V1_pad) * 4)
        hnew, logits = pl.pallas_call(
            functools.partial(_gru_output_kernel, hp=self.Hp),
            out_shape=(jax.ShapeDtypeStruct((B, self.Hp), jnp.float32),
                       jax.ShapeDtypeStruct((B, self.V1_pad), jnp.float32)),
            in_specs=[_VMEM] * 7,
            out_specs=(_VMEM, _VMEM),
            cost_estimate=cost,
        )(x, h0, wx, wh, b, self.out_w, self.out_b)
        return logits[:, :self.V1], hnew[:, :self.H], hnew

    def embed_bot_rnn(self, ind, X_loc, h_2_t, hidden):
        """Fused mode='embedding' + mode='bot_rnn'.

        TODO(synk): assumes the external cap_step builds the bot-GRU input as
        cat([embed(ind), X_loc, h_2_t], -1) (matches first_layer_input_dim).
        Returns (xt (B,E), output (B,H), hidden_padded (B,128)).
        """
        ids = jnp.asarray(ind, jnp.int32).reshape(-1)
        B = ids.shape[0]
        xloc = jnp.asarray(X_loc, jnp.float32).reshape(B, self.X_loc_dim)
        h2t = jnp.asarray(h_2_t, jnp.float32).reshape(B, self.H)
        h0 = self._prep_hidden(hidden, B)
        wxe, wxl, wxt = self.bot_fused_wx
        _, wh, b = self.bot_params
        cost = pl.CostEstimate(
            flops=2 * B * (self.E_pad + self.X_loc_dim + self.H + self.Hp) * self.G,
            transcendentals=3 * B * self.Hp,
            bytes_accessed=_nbytes(ids, self.embed_table, xloc, h2t, h0,
                                   wxe, wxl, wxt, wh, b)
            + B * (self.E_pad + self.Hp) * 4)
        xt, hnew = pl.pallas_call(
            functools.partial(_embed_gru_kernel, hp=self.Hp, v1=self.V1),
            out_shape=(jax.ShapeDtypeStruct((B, self.E_pad), jnp.float32),
                       jax.ShapeDtypeStruct((B, self.Hp), jnp.float32)),
            in_specs=[_SMEM] + [_VMEM] * 9,
            out_specs=(_VMEM, _VMEM),
            cost_estimate=cost,
        )(ids, self.embed_table, xloc, h2t, h0, wxe, wxl, wxt, wh, b)
        return xt[:, :self.E], hnew[:, :self.H], hnew

    # ---- public forward (same modes as the PyTorch module) ------------------

    def forward(self, vec=None, ind=None, cap_input=None, hidden=None,
                h_2_t=None, mode='step'):
        if mode == 'embedding':
            return self._embedding(ind)
        elif mode == 'bot_rnn':
            return self._gru_mode(cap_input, hidden, self.bot_params, self.din1)
        elif mode == 'top_rnn':
            return self._gru_mode(cap_input, hidden, self.top_params, self.din2)
        elif mode == 'output':
            return self._output(vec)
        # TODO(synk): mode='step' / sample_beam / beam_search depend on external
        # cap_step / ml task modules not defined in this file.
        raise ValueError(f"unsupported mode {mode!r}")

    __call__ = forward


# ----------------------------------------------------------------------------
# Demo + correctness checks
# ----------------------------------------------------------------------------

if __name__ == "__main__":
    key = jax.random.PRNGKey(0)
    (k_mod, k_ind, k_in1, k_h1, k_in2, k_h2, k_vec,
     k_xl, k_h2t, k_feat) = jax.random.split(key, 10)

    K = 4
    cap_hidden_dim = 32
    cap_emb_dim = 32
    vocab_size = 50
    cap_att_dim = 16
    X_loc_dim = 64
    B = 8

    mod = TaskModuleCapPallas(K, cap_hidden_dim, cap_emb_dim, vocab_size,
                              cap_att_dim, X_loc_dim, k_mod)

    # ---- original four modes ------------------------------------------------
    ind = jax.random.randint(k_ind, (B,), 0, vocab_size + 1)
    xt = mod(ind=ind, mode='embedding')

    cap_in1 = jax.random.normal(k_in1, (B, mod.first_layer_input_dim), jnp.float32)
    hidden1 = jax.random.normal(k_h1, (1, B, cap_hidden_dim), jnp.float32)
    bot_out, bot_hidden = mod(cap_input=cap_in1, hidden=hidden1, mode='bot_rnn')

    cap_in2 = jax.random.normal(k_in2, (B, mod.second_layer_input_dim), jnp.float32)
    hidden2 = jax.random.normal(k_h2, (1, B, cap_hidden_dim), jnp.float32)
    top_out, top_hidden = mod(cap_input=cap_in2, hidden=hidden2, mode='top_rnn')

    vec = jax.random.normal(k_vec, (B, cap_hidden_dim), jnp.float32)
    logits = mod(vec=vec, mode='output')

    assert xt.shape == (B, cap_emb_dim)
    assert bot_out.shape == (B, cap_hidden_dim)
    assert bot_hidden.shape == (1, B, cap_hidden_dim)
    assert top_out.shape == (B, cap_hidden_dim)
    assert top_hidden.shape == (1, B, cap_hidden_dim)
    assert logits.shape == (B, vocab_size + 1)

    # ---- numeric checks vs. a bf16-rounded pure-JAX reference ---------------
    wdt = mod.weight_dtype
    rt = lambda a: jnp.asarray(a, jnp.float32).astype(wdt).astype(jnp.float32)

    def ref_gru(x, h, raw):
        xq, hq = rt(x), rt(h)
        r = jax.nn.sigmoid(xq @ rt(raw['w_ih'][0]) + raw['b_ih'][0]
                           + hq @ rt(raw['w_hh'][0]) + raw['b_hh'][0])
        z = jax.nn.sigmoid(xq @ rt(raw['w_ih'][1]) + raw['b_ih'][1]
                           + hq @ rt(raw['w_hh'][1]) + raw['b_hh'][1])
        n = jnp.tanh(xq @ rt(raw['w_ih'][2]) + raw['b_ih'][2]
                     + r * (hq @ rt(raw['w_hh'][2]) + raw['b_hh'][2]))
        return (1.0 - z) * n + z * h

    maxdiff = lambda a, b: float(jnp.max(jnp.abs(a - b)))
    REF_TOL, FUSE_TOL = 3e-2, 1e-3

    emb_ref = jnp.maximum(mod.embed_table[ind, :cap_emb_dim], 0.0)
    assert maxdiff(xt, emb_ref) < 1e-6, "embedding gather mismatch"
    assert maxdiff(bot_out, ref_gru(cap_in1, hidden1[0], mod._raw_bot)) < REF_TOL
    assert maxdiff(top_out, ref_gru(cap_in2, hidden2[0], mod._raw_top)) < REF_TOL
    ow_raw, ob_raw = mod._raw_out
    assert maxdiff(logits, rt(vec) @ rt(ow_raw) + ob_raw) < REF_TOL

    # fused top_rnn+output  vs  composed top_rnn -> output
    f_logits, f_out, _ = mod.top_rnn_output(cap_in2, hidden2)
    assert maxdiff(f_out, top_out) < FUSE_TOL
    assert maxdiff(f_logits, mod(vec=top_out, mode='output')) < FUSE_TOL

    # fused embedding+bot_rnn  vs  composed embedding -> concat -> bot_rnn
    X_loc_feat = jax.random.normal(k_xl, (B, X_loc_dim), jnp.float32)
    h_2_t_feat = jax.random.normal(k_h2t, (B, cap_hidden_dim), jnp.float32)
    e_xt, e_out, _ = mod.embed_bot_rnn(ind, X_loc_feat, h_2_t_feat, hidden1)
    comp_in = jnp.concatenate([xt, X_loc_feat, h_2_t_feat], axis=-1)
    c_out, _ = mod(cap_input=comp_in, hidden=hidden1, mode='bot_rnn')
    assert maxdiff(e_xt, xt) < 1e-6
    assert maxdiff(e_out, c_out) < FUSE_TOL

    # ---- jitted fused greedy decode steps (lane-dense hidden threading) -----
    top_feats = jax.random.normal(
        k_feat, (B, mod.second_layer_input_dim - cap_hidden_dim), jnp.float32)

    @jax.jit
    def fused_decode_step(it, bot_h, top_h):
        # TODO(synk): the real cap_step computes h_2_t / the 1000-d top features
        # via external attention modules between the two GRUs; fixed dummy
        # features are used here.
        _, bot_o, bot_h = mod.embed_bot_rnn(it, X_loc_feat, h_2_t_feat, bot_h)
        lgt, _, top_h = mod.top_rnn_output(
            jnp.concatenate([bot_o, top_feats], axis=-1), top_h)
        nxt = jnp.argmax(lgt, axis=-1).astype(jnp.int32)
        return nxt, bot_h, top_h, lgt

    it = jnp.zeros((B,), jnp.int32)
    bot_h = jnp.zeros((B, mod.Hp), jnp.float32)
    top_h = jnp.zeros((B, mod.Hp), jnp.float32)
    for _ in range(4):
        it, bot_h, top_h, step_logits = fused_decode_step(it, bot_h, top_h)
    assert step_logits.shape == (B, vocab_size + 1)

    for t in (xt, bot_out, bot_hidden, top_out, top_hidden, logits,
              f_logits, e_out, it, step_logits):
        jax.block_until_ready(t)

    print("KERNEL_OK")
</pallas_src>

<mosaic_0001>
module attributes {stable_mosaic.version = 11 : i64} {
  func.func @_embed_kernel(%arg0: memref<8xi32, #tpu.memory_space<smem>>, %arg1: memref<56x128xf32, #tpu.memory_space<vmem>>, %arg2: memref<8x128xf32, #tpu.memory_space<vmem>>) attributes {dimension_semantics = [], scalar_prefetch = 0 : i64, scratch_operands = 0 : i64, tpu.core_type = #tpu.core_type<tc>} {
    %c0 = arith.constant 0 : index
    %0 = memref.load %arg0[%c0] : memref<8xi32, #tpu.memory_space<smem>>
    %c0_i32 = arith.constant 0 : i32
    %c50_i32 = arith.constant 50 : i32
    %1 = arith.maxsi %c0_i32, %0 : i32
    %2 = arith.minsi %c50_i32, %1 : i32
    %3 = arith.index_cast %2 : i32 to index
    %c0_0 = arith.constant 0 : index
    %4 = vector.load %arg1[%3, %c0_0] : memref<56x128xf32, #tpu.memory_space<vmem>>, vector<1x128xf32>
    %cst = arith.constant 0.000000e+00 : f32
    %5 = vector.broadcast %cst : f32 to vector<1x128xf32>
    %6 = arith.maximumf %4, %5 : vector<1x128xf32>
    %c0_1 = arith.constant 0 : index
    %c0_2 = arith.constant 0 : index
    %7 = vector.load %arg2[%c0_1, %c0_2] : memref<8x128xf32, #tpu.memory_space<vmem>>, vector<1x128xf32>
    tpu.vector_store %arg2[%c0_1, %c0_2], %6 {strides = array<i32>} : memref<8x128xf32, #tpu.memory_space<vmem>>, vector<1x128xf32>,
    %c1 = arith.constant 1 : index
    %8 = memref.load %arg0[%c1] : memref<8xi32, #tpu.memory_space<smem>>
    %c0_i32_3 = arith.constant 0 : i32
    %c50_i32_4 = arith.constant 50 : i32
    %9 = arith.maxsi %c0_i32_3, %8 : i32
    %10 = arith.minsi %c50_i32_4, %9 : i32
    %11 = arith.index_cast %10 : i32 to index
    %c0_5 = arith.constant 0 : index
    %12 = vector.load %arg1[%11, %c0_5] : memref<56x128xf32, #tpu.memory_space<vmem>>, vector<1x128xf32>
    %cst_6 = arith.constant 0.000000e+00 : f32
    %13 = vector.broadcast %cst_6 : f32 to vector<1x128xf32>
    %14 = arith.maximumf %12, %13 : vector<1x128xf32>
    %c1_7 = arith.constant 1 : index
    %c0_8 = arith.constant 0 : index
    %15 = vector.load %arg2[%c1_7, %c0_8] : memref<8x128xf32, #tpu.memory_space<vmem>>, vector<1x128xf32>
    tpu.vector_store %arg2[%c1_7, %c0_8], %14 {strides = array<i32>} : memref<8x128xf32, #tpu.memory_space<vmem>>, vector<1x128xf32>,
    %c2 = arith.constant 2 : index
    %16 = memref.load %arg0[%c2] : memref<8xi32, #tpu.memory_space<smem>>
    %c0_i32_9 = arith.constant 0 : i32
    %c50_i32_10 = arith.constant 50 : i32
    %17 = arith.maxsi %c0_i32_9, %16 : i32
    %18 = arith.minsi %c50_i32_10, %17 : i32
    %19 = arith.index_cast %18 : i32 to index
    %c0_11 = arith.constant 0 : index
    %20 = vector.load %arg1[%19, %c0_11] : memref<56x128xf32, #tpu.memory_space<vmem>>, vector<1x128xf32>
    %cst_12 = arith.constant 0.000000e+00 : f32
    %21 = vector.broadcast %cst_12 : f32 to vector<1x128xf32>
    %22 = arith.maximumf %20, %21 : vector<1x128xf32>
    %c2_13 = arith.constant 2 : index
    %c0_14 = arith.constant 0 : index
    %23 = vector.load %arg2[%c2_13, %c0_14] : memref<8x128xf32, #tpu.memory_space<vmem>>, vector<1x128xf32>
    tpu.vector_store %arg2[%c2_13, %c0_14], %22 {strides = array<i32>} : memref<8x128xf32, #tpu.memory_space<vmem>>, vector<1x128xf32>,
    %c3 = arith.constant 3 : index
    %24 = memref.load %arg0[%c3] : memref<8xi32, #tpu.memory_space<smem>>
    %c0_i32_15 = arith.constant 0 : i32
    %c50_i32_16 = arith.constant 50 : i32
    %25 = arith.maxsi %c0_i32_15, %24 : i32
    %26 = arith.minsi %c50_i32_16, %25 : i32
    %27 = arith.index_cast %26 : i32 to index
    %c0_17 = arith.constant 0 : index
    %28 = vector.load %arg1[%27, %c0_17] : memref<56x128xf32, #tpu.memory_space<vmem>>, vector<1x128xf32>
    %cst_18 = arith.constant 0.000000e+00 : f32
    %29 = vector.broadcast %cst_18 : f32 to vector<1x128xf32>
    %30 = arith.maximumf %28, %29 : vector<1x128xf32>
    %c3_19 = arith.constant 3 : index
    %c0_20 = arith.constant 0 : index
    %31 = vector.load %arg2[%c3_19, %c0_20] : memref<8x128xf32, #tpu.memory_space<vmem>>, vector<1x128xf32>
    tpu.vector_store %arg2[%c3_19, %c0_20], %30 {strides = array<i32>} : memref<8x128xf32, #tpu.memory_space<vmem>>, vector<1x128xf32>,
    %c4 = arith.constant 4 : index
    %32 = memref.load %arg0[%c4] : memref<8xi32, #tpu.memory_space<smem>>
    %c0_i32_21 = arith.constant 0 : i32
    %c50_i32_22 = arith.constant 50 : i32
    %33 = arith.maxsi %c0_i32_21, %32 : i32
    %34 = arith.minsi %c50_i32_22, %33 : i32
    %35 = arith.index_cast %34 : i32 to index
    %c0_23 = arith.constant 0 : index
    %36 = vector.load %arg1[%35, %c0_23] : memref<56x128xf32, #tpu.memory_space<vmem>>, vector<1x128xf32>
    %cst_24 = arith.constant 0.000000e+00 : f32
    %37 = vector.broadcast %cst_24 : f32 to vector<1x128xf32>
    %38 = arith.maximumf %36, %37 : vector<1x128xf32>
    %c4_25 = arith.constant 4 : index
    %c0_26 = arith.constant 0 : index
    %39 = vector.load %arg2[%c4_25, %c0_26] : memref<8x128xf32, #tpu.memory_space<vmem>>, vector<1x128xf32>
    tpu.vector_store %arg2[%c4_25, %c0_26], %38 {strides = array<i32>} : memref<8x128xf32, #tpu.memory_space<vmem>>, vector<1x128xf32>,
    %c5 = arith.constant 5 : index
    %40 = memref.load %arg0[%c5] : memref<8xi32, #tpu.memory_space<smem>>
    %c0_i32_27 = arith.constant 0 : i32
    %c50_i32_28 = arith.constant 50 : i32
    %41 = arith.maxsi %c0_i32_27, %40 : i32
    %42 = arith.minsi %c50_i32_28, %41 : i32
    %43 = arith.index_cast %42 : i32 to index
    %c0_29 = arith.constant 0 : index
    %44 = vector.load %arg1[%43, %c0_29] : memref<56x128xf32, #tpu.memory_space<vmem>>, vector<1x128xf32>
    %cst_30 = arith.constant 0.000000e+00 : f32
    %45 = vector.broadcast %cst_30 : f32 to vector<1x128xf32>
    %46 = arith.maximumf %44, %45 : vector<1x128xf32>
    %c5_31 = arith.constant 5 : index
    %c0_32 = arith.constant 0 : index
    %47 = vector.load %arg2[%c5_31, %c0_32] : memref<8x128xf32, #tpu.memory_space<vmem>>, vector<1x128xf32>
    tpu.vector_store %arg2[%c5_31, %c0_32], %46 {strides = array<i32>} : memref<8x128xf32, #tpu.memory_space<vmem>>, vector<1x128xf32>,
    %c6 = arith.constant 6 : index
    %48 = memref.load %arg0[%c6] : memref<8xi32, #tpu.memory_space<smem>>
    %c0_i32_33 = arith.constant 0 : i32
    %c50_i32_34 = arith.constant 50 : i32
    %49 = arith.maxsi %c0_i32_33, %48 : i32
    %50 = arith.minsi %c50_i32_34, %49 : i32
    %51 = arith.index_cast %50 : i32 to index
    %c0_35 = arith.constant 0 : index
    %52 = vector.load %arg1[%51, %c0_35] : memref<56x128xf32, #tpu.memory_space<vmem>>, vector<1x128xf32>
    %cst_36 = arith.constant 0.000000e+00 : f32
    %53 = vector.broadcast %cst_36 : f32 to vector<1x128xf32>
    %54 = arith.maximumf %52, %53 : vector<1x128xf32>
    %c6_37 = arith.constant 6 : index
    %c0_38 = arith.constant 0 : index
    %55 = vector.load %arg2[%c6_37, %c0_38] : memref<8x128xf32, #tpu.memory_space<vmem>>, vector<1x128xf32>
    tpu.vector_store %arg2[%c6_37, %c0_38], %54 {strides = array<i32>} : memref<8x128xf32, #tpu.memory_space<vmem>>, vector<1x128xf32>,
    %c7 = arith.constant 7 : index
    %56 = memref.load %arg0[%c7] : memref<8xi32, #tpu.memory_space<smem>>
    %c0_i32_39 = arith.constant 0 : i32
    %c50_i32_40 = arith.constant 50 : i32
    %57 = arith.maxsi %c0_i32_39, %56 : i32
    %58 = arith.minsi %c50_i32_40, %57 : i32
    %59 = arith.index_cast %58 : i32 to index
    %c0_41 = arith.constant 0 : index
    %60 = vector.load %arg1[%59, %c0_41] : memref<56x128xf32, #tpu.memory_space<vmem>>, vector<1x128xf32>
    %cst_42 = arith.constant 0.000000e+00 : f32
    %61 = vector.broadcast %cst_42 : f32 to vector<1x128xf32>
    %62 = arith.maximumf %60, %61 : vector<1x128xf32>
    %c7_43 = arith.constant 7 : index
    %c0_44 = arith.constant 0 : index
    %63 = vector.load %arg2[%c7_43, %c0_44] : memref<8x128xf32, #tpu.memory_space<vmem>>, vector<1x128xf32>
    tpu.vector_store %arg2[%c7_43, %c0_44], %62 {strides = array<i32>} : memref<8x128xf32, #tpu.memory_space<vmem>>, vector<1x128xf32>,
    return
  }
}

</mosaic_0001>

<bundles_post_ra>
// kernel: tpu_custom_call.1
= control target key start
LH: loop header
LB: loop body
LE: loop exit
PB: predicated region body
PF: predicated region fallthrough
CT: control target
= control target key end

     0   :  { %7 = vsyncpa [#allocation5], 0  ;;  %s342_s0 = inlined_call_operand.hbm [shape: s32[8], index: 0, kind: input, shape index: {}]   ;;  %s343_s1 = inlined_call_operand.hbm [shape: f32[56,128], index: 1, kind: input, shape index: {}]   ;;  %s344_s2 = inlined_call_operand.hbm [shape: f32[8,128], index: 2, kind: output, shape index: {}]  }
   0x1   :  { %8 = vsyncpa [#allocation3], 0 }
   0x2   :  { %9 = vsyncpa [#allocation4], 0  ;;  %s201_s11 = scalar_lea.hbm %s342_s0, 16 }
   0x3   :  { %p202_p0 = scmp.ne.s32.totalorder %s342_s0, %s201_s11  ;;  %p205_p1 = scmp.lt.u32.totalorder %s201_s11, %s342_s0 }
   0x5   :  { %p207_p2 = pnand %p205_p1, %p202_p0 }
   0x7   :  { %210 = shalt.err (!%p207_p2)
}
   0x8   :  { %s261_s16 = smov [#allocation2]   ;;  %s262_s19 = smov [#allocation6]  }
   0x9   :  { %17 = dma.hbm_to_smem %s342_s0, 16, %s261_s16, [#allocation5]  }
   0xa   :  { %s23_s20 = sshll.u32 %s262_s19, 4  ;;  %s211_s23 = scalar_lea.hbm %s343_s1, 896  ;;  %s24_s20 = int_to_ptr.vmem [resolvable:$true] %s23_s20 }
   0xb   :  { %p212_p3 = scmp.ne.s32.totalorder %s343_s1, %s211_s23  ;;  %p215_p4 = scmp.lt.u32.totalorder %s211_s23, %s343_s1 }
   0xd   :  { %p217_p5 = pnand %p215_p4, %p212_p3 }
   0xf   :  { %220 = shalt.err (!%p217_p5)
}
  0x10   :  { %s221_s28 = scalar_lea.vmem %s24_s20, 896  ;;  %p226_p7 = scmp.lt.s32.totalorder %s24_s20, %s24_s20 }
  0x11   :  { %p222_p6 = scmp.ne.s32.totalorder %s24_s20, %s221_s28  ;;  %p227_p8 = scmp.lt.s32.totalorder %s221_s28, %s221_s28 }
  0x13   :  { %p228_p9 = por %p227_p8, %p226_p7 }
  0x15   :  { %p229_p10 = pnand %p228_p9, %p222_p6 }
  0x17   :  { %232 = shalt.err (!%p229_p10)
}
  0x18   :  { %s263_s0 = smov 128   ;;  %s264_s29 = smov 8  }
  0x19   :  { %29 = dma.hbm_to_vmem [thread:$0]  %s343_s1, 896, %s24_s20, [#allocation3], %s263_s0, %s263_s0, %s264_s29  }
  0x1a   :  { %255 = dma.done.wait [#allocation5], 16  }
  0x1b   :  { %256 = vsyncadd [#allocation5], 4294967280 }
  0x1c   :  { %257 = dma.done.wait [#allocation3], 896  }
  0x1d   :  { %258 = vsyncadd [#allocation3], 4294966400 }
  0x1e   :  { %36 = sfence }
  0x1f   :  { %s37_s4 = sld [smem:[#allocation2]]  ;;  %s138_s5 = sld [smem:[#allocation2 + $0x1]] }
  0x20   :  { %s144_s6 = sld [smem:[#allocation2 + $0x2]]  ;;  %s305_s7 = sld [smem:[#allocation2 + $0x3]] }
  0x21   :  { %s307_s8 = sld [smem:[#allocation2 + $0x4]]  ;;  %s309_s9 = sld [smem:[#allocation2 + $0x5]] }
  0x22   :  { %s311_s10 = sld [smem:[#allocation2 + $0x6]]  ;;  %s313_s11 = sld [smem:[#allocation2 + $0x7]] }
  0x23   :  { %s265_s20 = smov [#allocation7]  }
  0x24   :  { %s115_s21 = sshll.u32 %s265_s20, 4  ;;  %s116_s21 = int_to_ptr.vmem [resolvable:$true] %s115_s21 }
  0x25   :  { %p38_p11 = scmp.gt.s32.totalorder %s37_s4, 0  ;;  %p133_p12 = scmp.lt.s32.totalorder %s37_s4, 50 }
  0x26   :  { %p47_p13 = scmp.gt.s32.totalorder %s138_s5, 0  ;;  %p139_p0 = scmp.lt.s32.totalorder %s138_s5, 50 }
  0x27   :  { %s346_s4 = smov (!%p38_p11, %s37_s4), 0  ;;  %p56_p1 = scmp.gt.s32.totalorder %s144_s6, 0 }
  0x28   :  { %s348_s5 = smov (!%p47_p13, %s138_s5), 0  ;;  %s350_s4 = smov (!%p133_p12, %s346_s4), 50 }
  0x29   :  { %s352_s5 = smov (!%p139_p0, %s348_s5), 50  ;;  %s42_s1 = scalar_lea.vmem [#allocation6], %s350_s4 }
  0x2a   :  { %v43_v0 = vld [vmem:[%s42_s1] sm:$0x1]  ;;  %p145_p2 = scmp.lt.s32.totalorder %s144_s6, 50  ;;  %s51_s12 = scalar_lea.vmem [#allocation6], %s352_s5 }
  0x2b   :  { %v44_v1 = vmax.f32 %v43_v0, 0.0  ;;  %v52_v2 = vld [vmem:[%s51_s12] sm:$0x1]  ;;  %s354_s6 = smov (!%p56_p1, %s144_s6), 0  ;;  %p65_p3 = scmp.gt.s32.totalorder %s305_s7, 0 }
  0x2c   :  { %v53_v3 = vmax.f32 %v52_v2, 0.0  ;;  %p151_p4 = scmp.lt.s32.totalorder %s305_s7, 50  ;;  %s356_s6 = smov (!%p145_p2, %s354_s6), 50 }
  0x2d   :  { %45 = vst [vmem:[#allocation7] sm:$0x1] %v44_v1  ;;  %s358_s7 = smov (!%p65_p3, %s305_s7), 0  ;;  %p74_p5 = scmp.gt.s32.totalorder %s307_s8, 0 }
  0x2e   :  { %54 = vst [vmem:[#allocation7 + $0x1] sm:$0x1] %v53_v3  ;;  %s60_s13 = scalar_lea.vmem [#allocation6], %s356_s6  ;;  %s360_s7 = smov (!%p151_p4, %s358_s7), 50 }
  0x2f   :  { %v61_v4 = vld [vmem:[%s60_s13] sm:$0x1]  ;;  %s75_s14 = scalar_select %p74_p5, %s307_s8, 0 }
  0x30   :  { %v62_v5 = vmax.f32 %v61_v4, 0.0  ;;  %p157_p6 = scmp.lt.s32.totalorder %s307_s8, 50  ;;  %s69_s15 = scalar_lea.vmem [#allocation6], %s360_s7 }
  0x31   :  { %v70_v6 = vld [vmem:[%s69_s15] sm:$0x1]  ;;  %p83_p7 = scmp.gt.s32.totalorder %s309_s9, 0  ;;  %p163_p8 = scmp.lt.s32.totalorder %s309_s9, 50 }
  0x32   :  { %63 = vst [vmem:[#allocation7 + $0x2] sm:$0x1] %v62_v5  ;;  %v71_v7 = vmax.f32 %v70_v6, 0.0  ;;  %s362_s14 = smov (!%p157_p6, %s75_s14), 50  ;;  %p92_p9 = scmp.gt.s32.totalorder %s311_s10, 0 }
  0x33   :  { %s364_s9 = smov (!%p83_p7, %s309_s9), 0  ;;  %s78_s16 = scalar_lea.vmem [#allocation6], %s362_s14 }
  0x34   :  { %72 = vst [vmem:[#allocation7 + $0x3] sm:$0x1] %v71_v7  ;;  %v79_v8 = vld [vmem:[%s78_s16] sm:$0x1]  ;;  %s366_s9 = smov (!%p163_p8, %s364_s9), 50  ;;  %p169_p10 = scmp.lt.s32.totalorder %s311_s10, 50 }
  0x35   :  { %v80_v9 = vmax.f32 %v79_v8, 0.0  ;;  %s93_s17 = scalar_select %p92_p9, %s311_s10, 0 }
  0x36   :  { %s87_s18 = scalar_lea.vmem [#allocation6], %s366_s9  ;;  %p101_p11 = scmp.gt.s32.totalorder %s313_s11, 0 }
  0x37   :  { %81 = vst [vmem:[#allocation7 + $0x4] sm:$0x1] %v80_v9  ;;  %v88_v10 = vld [vmem:[%s87_s18] sm:$0x1]  ;;  %p175_p12 = scmp.lt.s32.totalorder %s313_s11, 50  ;;  %s368_s17 = smov (!%p169_p10, %s93_s17), 50 }
  0x38   :  { %v89_v11 = vmax.f32 %v88_v10, 0.0  ;;  %s370_s11 = smov (!%p101_p11, %s313_s11), 0  ;;  %s96_s19 = scalar_lea.vmem [#allocation6], %s368_s17 }
  0x39   :  { %v97_v12 = vld [vmem:[%s96_s19] sm:$0x1]  ;;  %s372_s11 = smov (!%p175_p12, %s370_s11), 50  ;;  %s233_s23 = scalar_lea.vmem %s116_s21, 128 }
  0x3a   :  { %90 = vst [vmem:[#allocation7 + $0x5] sm:$0x1] %v89_v11  ;;  %v98_v13 = vmax.f32 %v97_v12, 0.0  ;;  %s105_s22 = scalar_lea.vmem [#allocation6], %s372_s11  ;;  %p234_p13 = scmp.ne.s32.totalorder %s116_s21, %s233_s23 }
  0x3b   :  { %v106_v14 = vld [vmem:[%s105_s22] sm:$0x1]  ;;  %p238_p0 = scmp.lt.s32.totalorder %s116_s21, %s116_s21  ;;  %p239_p1 = scmp.lt.s32.totalorder %s233_s23, %s233_s23 }
  0x3c   :  { %99 = vst [vmem:[#allocation7 + $0x6] sm:$0x1] %v98_v13  ;;  %v107_v15 = vmax.f32 %v106_v14, 0.0 }
  0x3d   :  { %p240_p2 = por %p239_p1, %p238_p0 }
  0x3e   :  { %108 = vst [vmem:[#allocation7 + $0x7] sm:$0x1] %v107_v15 }
  0x3f   :  { %p241_p3 = pnand %p240_p2, %p234_p13 }
  0x41   :  { %244 = shalt.err (!%p241_p3)
}
  0x42   :  { %s245_s26 = scalar_lea.hbm %s344_s2, 128 }
  0x43   :  { %p246_p4 = scmp.ne.s32.totalorder %s344_s2, %s245_s26  ;;  %p249_p5 = scmp.lt.u32.totalorder %s245_s26, %s344_s2 }
  0x45   :  { %p251_p6 = pnand %p249_p5, %p246_p4 }
  0x47   :  { %254 = shalt.err (!%p251_p6)
}
  0x48   :  { %118 = dma.vmem_to_hbm [thread:$0]  %s116_s21, 128, %s344_s2, [#allocation4]  }
  0x49   :  { %259 = dma.done.wait [#allocation4], 128  }
  0x4a   :  { %260 = vsyncadd [#allocation4], 4294967168 }
  0x4b   :  { %122 = vsyncpa [#allocation3], 1 }
  0x4c   :  { %123 = vsyncpa [#allocation4], 1 }
  0x4d   :  { %124 = vsyncpa [#allocation5], 1 }

</bundles_post_ra>
